<compile_context>
chip_gen: v6e
topology: v6e:2x2x1
jax: 0.10.0
libtpu: 0.0.40
codegen_flags: <defaults>
</compile_context>

<pallas_src>
import math

import jax
import jax.numpy as jnp
from jax.experimental import pallas as pl
from jax.experimental.pallas import tpu as pltpu

# ----------------------------------------------------------------------------
# Deterministic stand-ins for cfg.MODEL.ROI_RELATION_HEAD.BIAS_MODULE.PENALTY_BIAS
# ----------------------------------------------------------------------------
PENALTY_TYPE = "psb_pair"     # the penalty variant implemented here
EPS = 1e-3                    # PENALTY_EPSILON (> 0, so no statistics override)
PSB_DEFAULT = 0.02            # POSSIBLE_BIAS_DEFAULT_VALUE
BG_DEFAULT = 0.02             # BG_DEFAULT_VALUE
FUSION_WEIGHT = 1.0
ONLY_RTPB = False
EVAL_WITH_PENALTY = False

LOG_PSB = math.log(PSB_DEFAULT)
LOG_BG = math.log(BG_DEFAULT)

LANE = 128                    # vreg lane width


# ----------------------------------------------------------------------------
# Pallas kernel: lane-dense fuse of predicted distribution with precomputed bias
# ----------------------------------------------------------------------------
def _fuse_kernel(pred_ref, bias_ref, out_ref):
    p = pred_ref[...].astype(jnp.float32)
    b = bias_ref[...]
    out_ref[...] = (p + b * FUSION_WEIGHT).astype(out_ref.dtype)


def _round_up(x, m):
    return ((x + m - 1) // m) * m


def _choose_tile_rows(rows, tile_rows):
    if rows >= 2 * tile_rows:
        return tile_rows
    # Keep >= 2 grid steps when the problem allows it so both v7x TensorCores
    # get work; 16-sublane multiple keeps the block valid for f32 and bf16.
    return max(16, _round_up(pl.cdiv(rows, 2), 16))


def fused_penalty_add(pred_dist, bias, *, tile_rows=2048):
    """out = pred_dist + bias * FUSION_WEIGHT, streamed lane-dense through VMEM."""
    N, R = pred_dist.shape
    out_dtype = pred_dist.dtype
    L = N * R

    rows = pl.cdiv(L, LANE)
    tr = _choose_tile_rows(rows, tile_rows)
    rows_padded = _round_up(rows, tr)
    grid = rows_padded // tr
    pad = rows_padded * LANE - L

    # Pack k rows of width R per 128-lane group (free row-major reshape):
    # the fuse is purely elementwise, so row structure is irrelevant in-kernel.
    pred_flat = pred_dist.reshape(-1)
    bias_flat = bias.astype(jnp.float32).reshape(-1)
    if pad:
        pred_flat = jnp.pad(pred_flat, (0, pad))
        bias_flat = jnp.pad(bias_flat, (0, pad))
    pred2d = pred_flat.reshape(rows_padded, LANE)
    bias2d = bias_flat.reshape(rows_padded, LANE)

    out2d = pl.pallas_call(
        _fuse_kernel,
        out_shape=jax.ShapeDtypeStruct((rows_padded, LANE), out_dtype),
        grid_spec=pltpu.PrefetchScalarGridSpec(
            num_scalar_prefetch=0,
            grid=(grid,),
            in_specs=[
                pl.BlockSpec((tr, LANE), lambda i: (i, 0)),
                pl.BlockSpec((tr, LANE), lambda i: (i, 0)),
            ],
            out_specs=pl.BlockSpec((tr, LANE), lambda i: (i, 0)),
        ),
        compiler_params=pltpu.CompilerParams(
            dimension_semantics=("parallel",),
        ),
    )(pred2d, bias2d)

    return out2d.reshape(-1)[:L].reshape(N, R)


# ----------------------------------------------------------------------------
# Module wrapper (mirrors PenaltyModule.__init__ / forward for 'psb_pair')
# ----------------------------------------------------------------------------
class PenaltyModulePallas:
    def __init__(self, fg_matrix):
        # statistics['fg_matrix'], with background relation zeroed
        fg = jnp.asarray(fg_matrix, dtype=jnp.float32)
        fg = fg.at[:, :, 0].set(0.0)
        self.num_obj = fg.shape[0]
        self.num_rel = fg.shape[-1]
        # 'psb_pair': flatten (num_obj, num_obj, num_rel) -> (num_obj^2, num_rel)
        self.fg_count = fg.reshape(-1, self.num_rel)

        # Precompute the resistance-bias table once (perf feedback #1).
        # Row-local math, so per-table-row precompute + gather == gather + compute.
        row_sum = self.fg_count.sum(axis=1, keepdims=True)
        rb = jnp.log(self.fg_count / (row_sum + EPS) + EPS)
        rb = jnp.where(self.fg_count == 0.0, LOG_PSB, rb)   # unseen relations
        rb = rb.at[:, 0].set(LOG_BG)                          # background column
        self.log_bias = rb                                    # (num_obj^2, num_rel) f32

        self.training = True
        self.eval_with_penalty = EVAL_WITH_PENALTY

    def __call__(self, pred_dist, gt=None, obj_pair=None):
        if not (self.training or self.eval_with_penalty):
            return pred_dist
        # glue: gather per-pair bias rows (data-dependent row gather, fused by XLA)
        pair_idx = (obj_pair[:, 0] * self.num_obj + obj_pair[:, 1]).astype(jnp.int32)
        bias = jnp.take(self.log_bias, pair_idx, axis=0)      # (N, num_rel)
        if ONLY_RTPB:
            return bias
        return fused_penalty_add(pred_dist, bias)


# ----------------------------------------------------------------------------
# Pure-JAX reference (mirrors the torch code path) for verification
# ----------------------------------------------------------------------------
def _reference(pred_dist, counts):
    row_sum = counts.sum(axis=1, keepdims=True)
    rb = jnp.log(counts / (row_sum + EPS) + EPS)
    rb = jnp.where(counts == 0.0, LOG_PSB, rb)
    rb = rb.at[:, 0].set(LOG_BG)
    if ONLY_RTPB:
        return rb
    return pred_dist + rb * FUSION_WEIGHT


if __name__ == "__main__":
    key = jax.random.PRNGKey(0)
    k1, k2, k3, k4, k5 = jax.random.split(key, 5)

    num_obj, num_rel = 8, 32

    # synthetic statistics['fg_matrix'] (deterministic, no checkpoint load)
    fg_matrix = jax.random.randint(k1, (num_obj, num_obj, num_rel), 0, 20)
    module = PenaltyModulePallas(fg_matrix)

    def check(n_pairs, kp, kd):
        obj_pair = jax.random.randint(kp, (n_pairs, 2), 0, num_obj)
        pred_dist = jax.random.normal(kd, (n_pairs, num_rel), dtype=jnp.float32)
        out = module(pred_dist, gt=None, obj_pair=obj_pair)
        out = jax.block_until_ready(out)
        pair_idx = obj_pair[:, 0] * num_obj + obj_pair[:, 1]
        counts = jnp.take(module.fg_count, pair_idx, axis=0)
        ref = _reference(pred_dist, counts)
        assert out.shape == pred_dist.shape and out.dtype == pred_dist.dtype
        assert jnp.allclose(out, ref, atol=1e-5, rtol=1e-5), "mismatch vs reference"

    check(16, k2, k3)   # original small shape
    check(13, k4, k5)   # arbitrary (non-multiple) pair count: padding path

    # TODO(synk): other penalty_type branches ('log_bias', 'cb_cls', 'count_bias',
    # 'margin_loss', ...) only differ in init-time bias-table construction; the
    # runtime fusion reuses the same streaming kernel.
    print("KERNEL_OK")
</pallas_src>

<mosaic_0001>
module attributes {stable_mosaic.version = 11 : i64} {
  func.func @_fuse_kernel(%arg0: i32, %arg1: memref<16x128xf32, #tpu.memory_space<vmem>>, %arg2: memref<16x128xf32, #tpu.memory_space<vmem>>, %arg3: memref<16x128xf32, #tpu.memory_space<vmem>>) attributes {dimension_semantics = [#tpu.dimension_semantics<parallel>], iteration_bounds = array<i64: 1>, scalar_prefetch = 0 : i64, scratch_operands = 0 : i64, tpu.core_type = #tpu.core_type<tc>, window_params = [{transform_indices = @transform_0, window_bounds = array<i64: 16, 128>}, {transform_indices = @transform_1, window_bounds = array<i64: 16, 128>}, {transform_indices = @transform_2, window_bounds = array<i64: 16, 128>}]} {
    %c0 = arith.constant 0 : index
    %c0_0 = arith.constant 0 : index
    %0 = vector.load %arg1[%c0, %c0_0] : memref<16x128xf32, #tpu.memory_space<vmem>>, vector<16x128xf32>
    %c0_1 = arith.constant 0 : index
    %c0_2 = arith.constant 0 : index
    %1 = vector.load %arg2[%c0_1, %c0_2] : memref<16x128xf32, #tpu.memory_space<vmem>>, vector<16x128xf32>
    %cst = arith.constant 1.000000e+00 : f32
    %2 = vector.broadcast %cst : f32 to vector<16x128xf32>
    %3 = arith.mulf %1, %2 : vector<16x128xf32>
    %4 = arith.addf %0, %3 : vector<16x128xf32>
    %c0_3 = arith.constant 0 : index
    %c0_4 = arith.constant 0 : index
    %5 = vector.load %arg3[%c0_3, %c0_4] : memref<16x128xf32, #tpu.memory_space<vmem>>, vector<16x128xf32>
    tpu.vector_store %arg3[%c0_3, %c0_4], %4 {strides = array<i32>} : memref<16x128xf32, #tpu.memory_space<vmem>>, vector<16x128xf32>,
    return
  }
  func.func @transform_0(%arg0: i32) -> (i32, i32) {
    %c0_i32 = arith.constant 0 : i32
    %c0_i32_0 = arith.constant 0 : i32
    return %arg0, %c0_i32 : i32, i32
  }
  func.func @transform_1(%arg0: i32) -> (i32, i32) {
    %c0_i32 = arith.constant 0 : i32
    %c0_i32_0 = arith.constant 0 : i32
    return %arg0, %c0_i32 : i32, i32
  }
  func.func @transform_2(%arg0: i32) -> (i32, i32) {
    %c0_i32 = arith.constant 0 : i32
    %c0_i32_0 = arith.constant 0 : i32
    return %arg0, %c0_i32 : i32, i32
  }
}

</mosaic_0001>

<bundles_post_ra>
// kernel: tpu_custom_call.1
= control target key start
LH: loop header
LB: loop body
LE: loop exit
PB: predicated region body
PF: predicated region fallthrough
CT: control target
= control target key end

     0   :  { %7 = vsyncpa [#allocation3], 0  ;;  %s175_s0 = inlined_call_operand.hbm [shape: f32[16,128], index: 0, kind: input, shape index: {}]   ;;  %s176_s1 = inlined_call_operand.hbm [shape: f32[16,128], index: 1, kind: input, shape index: {}]   ;;  %s177_s2 = inlined_call_operand.hbm [shape: f32[16,128], index: 2, kind: output, shape index: {}]  }
   0x1   :  { %8 = vsyncpa [#allocation6], 0 }
   0x2   :  { %9 = vsyncpa [#allocation4], 0  ;;  %s137_s9 = smov [#allocation2]  }
   0x3   :  { %s15_s10 = sshll.u32 %s137_s9, 4  ;;  %s16_s10 = int_to_ptr.vmem [resolvable:$true] %s15_s10 }
   0x4   :  { %s79_s11 = scalar_lea.vmem %s16_s10, 256  ;;  %p84_p1 = scmp.lt.s32.totalorder %s16_s10, %s16_s10 }
   0x5   :  { %p80_p0 = scmp.ne.s32.totalorder %s16_s10, %s79_s11  ;;  %p85_p2 = scmp.lt.s32.totalorder %s79_s11, %s79_s11 }
   0x7   :  { %p86_p3 = por %p85_p2, %p84_p1 }
   0x9   :  { %p87_p4 = pnand %p86_p3, %p80_p0 }
   0xb   :  { %90 = shalt.err (!%p87_p4)
}
   0xc   :  { %s138_s12 = smov 128   ;;  %s139_s13 = smov 8  }
   0xd   :  { %21 = dma.hbm_to_vmem [thread:$0]  %s175_s0, 256, %s16_s10, [#allocation3], %s138_s12, %s138_s12, %s139_s13  }
   0xe   :  { %s140_s16 = smov [#allocation5]  }
   0xf   :  { %s27_s17 = sshll.u32 %s140_s16, 4  ;;  %s28_s17 = int_to_ptr.vmem [resolvable:$true] %s27_s17 }
  0x10   :  { %s99_s18 = scalar_lea.vmem %s28_s17, 256  ;;  %p104_p6 = scmp.lt.s32.totalorder %s28_s17, %s28_s17 }
  0x11   :  { %p100_p5 = scmp.ne.s32.totalorder %s28_s17, %s99_s18  ;;  %p105_p7 = scmp.lt.s32.totalorder %s99_s18, %s99_s18 }
  0x13   :  { %p106_p8 = por %p105_p7, %p104_p6 }
  0x15   :  { %p107_p9 = pnand %p106_p8, %p100_p5 }
  0x17   :  { %110 = shalt.err (!%p107_p9)
}
  0x18   :  { %33 = dma.hbm_to_vmem [thread:$0]  %s176_s1, 256, %s28_s17, [#allocation6], %s138_s12, %s138_s12, %s139_s13  }
  0x19   :  { %131 = dma.done.wait [#allocation3], 256  }
  0x1a   :  { %132 = vsyncadd [#allocation3], 4294967040 }
  0x1b   :  { %133 = dma.done.wait [#allocation6], 256  }
  0x1c   :  { %134 = vsyncadd [#allocation6], 4294967040  ;;  %s141_s0 = smov [#allocation7]   ;;  %v40_v0 = vld [vmem:[#allocation2] sm:$0xff]  ;;  %v42_v1 = vld [vmem:[#allocation5] sm:$0xff] }
  0x1d   :  { %s53_s21 = sshll.u32 %s141_s0, 4  ;;  %v41_v2 = vld [vmem:[#allocation2 + $0x8] sm:$0xff]  ;;  %v44_v3 = vadd.f32 %v42_v1, %v40_v0  ;;  %v43_v4 = vld [vmem:[#allocation5 + $0x8] sm:$0xff]  ;;  %s54_s21 = int_to_ptr.vmem [resolvable:$true] %s53_s21 }
  0x1e   :  { %v45_v5 = vadd.f32 %v43_v4, %v41_v2  ;;  %s111_s22 = scalar_lea.vmem %s54_s21, 256  ;;  %p116_p11 = scmp.lt.s32.totalorder %s54_s21, %s54_s21 }
  0x1f   :  { %46 = vst [vmem:[#allocation7] sm:$0xff] %v44_v3  ;;  %p112_p10 = scmp.ne.s32.totalorder %s54_s21, %s111_s22  ;;  %p117_p12 = scmp.lt.s32.totalorder %s111_s22, %s111_s22 }
  0x20   :  { %47 = vst [vmem:[#allocation7 + $0x8] sm:$0xff] %v45_v5 }
  0x21   :  { %p118_p13 = por %p117_p12, %p116_p11 }
  0x23   :  { %p119_p0 = pnand %p118_p13, %p112_p10 }
  0x25   :  { %122 = shalt.err (!%p119_p0)
}
  0x26   :  { %59 = dma.vmem_to_hbm [thread:$0]  %s54_s21, 256, %s177_s2, [#allocation4], %s138_s12, %s138_s12, %s139_s13  }
  0x27   :  { %135 = dma.done.wait [#allocation4], 256  }
  0x28   :  { %136 = vsyncadd [#allocation4], 4294967040 }
  0x29   :  { %63 = vsyncpa [#allocation3], 1 }
  0x2a   :  { %64 = vsyncpa [#allocation6], 1 }
  0x2b   :  { %65 = vsyncpa [#allocation4], 1 }

</bundles_post_ra>
